<compile_context>
chip_gen: v6e
topology: v6e:2x2x1
jax: 0.10.0
libtpu: 0.0.40
codegen_flags: <defaults>
</compile_context>

<pallas_src>
import jax
import jax.numpy as jnp
from jax.experimental import pallas as pl
from jax.experimental.pallas import tpu as pltpu

IN_FEATURES = 6
OUT_FEATURES = 2


def _linear_kernel(w_ref, b_ref, xt_ref, ot_ref):
    # w_ref:  (12,) f32 SMEM  -- row-major nn.Linear weight: w[n*6 + k] = W[n, k]
    # b_ref:  (2,)  f32 SMEM
    # xt_ref: (6, TB) f32 VMEM  (features on sublanes, batch on lanes)
    # ot_ref: (2, TB) f32 VMEM
    x_rows = [xt_ref[k:k + 1, :] for k in range(IN_FEATURES)]   # each (1, TB)
    for n in range(OUT_FEATURES):
        acc = x_rows[0] * w_ref[n * IN_FEATURES + 0]
        for k in range(1, IN_FEATURES):
            acc = acc + x_rows[k] * w_ref[n * IN_FEATURES + k]
        ot_ref[n:n + 1, :] = acc + b_ref[n]


def pong_model_forward_t(x_t, weight, bias, *, block_batch=131072):
    """Feature-major Pallas forward: x_t (6, batch) -> (2, batch).

    This is the zero-layout-shuffle entry point; prefer it when the caller can
    keep activations feature-major.
    """
    assert x_t.shape[0] == IN_FEATURES
    batch = x_t.shape[1]
    x_t = x_t.astype(jnp.float32)
    w_flat = weight.astype(jnp.float32).reshape(OUT_FEATURES * IN_FEATURES)
    b_flat = bias.astype(jnp.float32).reshape(OUT_FEATURES)

    # Lane-axis tile: a multiple of 128, or the full batch when it fits one
    # tile (block dims equal to the full array dims are always legal).
    block_batch = max(128, (block_batch // 128) * 128)
    tile_b = batch if batch <= block_batch else block_batch
    grid = (pl.cdiv(batch, tile_b),)

    bytes_accessed = 4 * (
        batch * IN_FEATURES            # x read
        + batch * OUT_FEATURES         # y write
        + IN_FEATURES * OUT_FEATURES   # weight
        + OUT_FEATURES                 # bias
    )

    return pl.pallas_call(
        _linear_kernel,
        out_shape=jax.ShapeDtypeStruct((OUT_FEATURES, batch), jnp.float32),
        grid=grid,
        in_specs=[
            pl.BlockSpec(memory_space=pltpu.MemorySpace.SMEM),   # weight (12,)
            pl.BlockSpec(memory_space=pltpu.MemorySpace.SMEM),   # bias   (2,)
            pl.BlockSpec((IN_FEATURES, tile_b), lambda i: (0, i)),
        ],
        out_specs=pl.BlockSpec((OUT_FEATURES, tile_b), lambda i: (0, i)),
        compiler_params=pltpu.CompilerParams(
            dimension_semantics=("parallel",),      # shards grid steps across TCs on v7x
            vmem_limit_bytes=32 * 1024 * 1024,      # covers v5e's 16 MiB default; < v7x physical
        ),
        cost_estimate=pl.CostEstimate(
            flops=2 * batch * IN_FEATURES * OUT_FEATURES,
            transcendentals=0,
            bytes_accessed=bytes_accessed,
        ),
    )(w_flat, b_flat, x_t)


def pong_model_forward(x, weight, bias, *, block_batch=131072):
    """PyTorch-layout forward matching PongModel: x (batch, 6) -> (batch, 2).

    Transposes to feature-major at the boundary (two small XLA transposes);
    callers that can supply feature-major data should use pong_model_forward_t
    directly to avoid even that traffic.
    """
    out_t = pong_model_forward_t(x.T, weight, bias, block_batch=block_batch)
    return out_t.T


def init_params(key):
    """Deterministic init matching nn.Linear(6, 2) (uniform +/- 1/sqrt(in))."""
    k_w, k_b = jax.random.split(key)
    bound = 1.0 / jnp.sqrt(jnp.float32(IN_FEATURES))
    weight = jax.random.uniform(
        k_w, (OUT_FEATURES, IN_FEATURES), jnp.float32, -bound, bound
    )
    bias = jax.random.uniform(k_b, (OUT_FEATURES,), jnp.float32, -bound, bound)
    return weight, bias


if __name__ == "__main__":
    key = jax.random.PRNGKey(0)
    k_x, k_p, k_x2 = jax.random.split(key, 3)

    weight, bias = init_params(k_p)

    # Small case (single tile).
    batch = 8
    x = jax.random.normal(k_x, (batch, IN_FEATURES), jnp.float32)
    out = jax.block_until_ready(pong_model_forward(x, weight, bias))
    ref = x @ weight.T + bias
    assert out.shape == (batch, OUT_FEATURES)
    assert jnp.allclose(out, ref, atol=1e-5, rtol=1e-5)

    # Larger case exercising the lane-tiled grid + ragged edge block
    # (1000 rows, 256-row tiles -> 4 grid steps, last one partial).
    batch2 = 1000
    x2 = jax.random.normal(k_x2, (batch2, IN_FEATURES), jnp.float32)
    out2 = jax.block_until_ready(
        pong_model_forward(x2, weight, bias, block_batch=256)
    )
    ref2 = x2 @ weight.T + bias
    assert out2.shape == (batch2, OUT_FEATURES)
    assert jnp.allclose(out2, ref2, atol=1e-5, rtol=1e-5)

    # Feature-major entry point directly (no wrapper transposes).
    out3 = jax.block_until_ready(
        pong_model_forward_t(x2.T, weight, bias, block_batch=256)
    )
    assert out3.shape == (OUT_FEATURES, batch2)
    assert jnp.allclose(out3.T, ref2, atol=1e-5, rtol=1e-5)

    print("KERNEL_OK")
</pallas_src>

<mosaic_0001>
module attributes {stable_mosaic.version = 11 : i64} {
  func.func @_linear_kernel(%arg0: i32, %arg1: memref<12xf32, #tpu.memory_space<smem>>, %arg2: memref<2xf32, #tpu.memory_space<smem>>, %arg3: memref<6x8xf32, #tpu.memory_space<vmem>>, %arg4: memref<2x8xf32, #tpu.memory_space<vmem>>) attributes {dimension_semantics = [#tpu.dimension_semantics<parallel>], iteration_bounds = array<i64: 1>, scalar_prefetch = 0 : i64, scratch_operands = 0 : i64, tpu.core_type = #tpu.core_type<tc>, window_params = [{transform_indices = @transform_0, window_bounds = array<i64: 12>}, {transform_indices = @transform_1, window_bounds = array<i64: 2>}, {transform_indices = @transform_2, window_bounds = array<i64: 6, 8>}, {transform_indices = @transform_3, window_bounds = array<i64: 2, 8>}]} {
    %c0 = arith.constant 0 : index
    %c0_0 = arith.constant 0 : index
    %0 = vector.load %arg3[%c0, %c0_0] : memref<6x8xf32, #tpu.memory_space<vmem>>, vector<1x8xf32>
    %c1 = arith.constant 1 : index
    %c0_1 = arith.constant 0 : index
    %1 = vector.load %arg3[%c1, %c0_1] : memref<6x8xf32, #tpu.memory_space<vmem>>, vector<1x8xf32>
    %c2 = arith.constant 2 : index
    %c0_2 = arith.constant 0 : index
    %2 = vector.load %arg3[%c2, %c0_2] : memref<6x8xf32, #tpu.memory_space<vmem>>, vector<1x8xf32>
    %c3 = arith.constant 3 : index
    %c0_3 = arith.constant 0 : index
    %3 = vector.load %arg3[%c3, %c0_3] : memref<6x8xf32, #tpu.memory_space<vmem>>, vector<1x8xf32>
    %c4 = arith.constant 4 : index
    %c0_4 = arith.constant 0 : index
    %4 = vector.load %arg3[%c4, %c0_4] : memref<6x8xf32, #tpu.memory_space<vmem>>, vector<1x8xf32>
    %c5 = arith.constant 5 : index
    %c0_5 = arith.constant 0 : index
    %5 = vector.load %arg3[%c5, %c0_5] : memref<6x8xf32, #tpu.memory_space<vmem>>, vector<1x8xf32>
    %c0_6 = arith.constant 0 : index
    %6 = memref.load %arg1[%c0_6] : memref<12xf32, #tpu.memory_space<smem>>
    %7 = vector.broadcast %6 : f32 to vector<1x8xf32>
    %8 = arith.mulf %0, %7 : vector<1x8xf32>
    %c1_7 = arith.constant 1 : index
    %9 = memref.load %arg1[%c1_7] : memref<12xf32, #tpu.memory_space<smem>>
    %10 = vector.broadcast %9 : f32 to vector<1x8xf32>
    %11 = arith.mulf %1, %10 : vector<1x8xf32>
    %12 = arith.addf %8, %11 : vector<1x8xf32>
    %c2_8 = arith.constant 2 : index
    %13 = memref.load %arg1[%c2_8] : memref<12xf32, #tpu.memory_space<smem>>
    %14 = vector.broadcast %13 : f32 to vector<1x8xf32>
    %15 = arith.mulf %2, %14 : vector<1x8xf32>
    %16 = arith.addf %12, %15 : vector<1x8xf32>
    %c3_9 = arith.constant 3 : index
    %17 = memref.load %arg1[%c3_9] : memref<12xf32, #tpu.memory_space<smem>>
    %18 = vector.broadcast %17 : f32 to vector<1x8xf32>
    %19 = arith.mulf %3, %18 : vector<1x8xf32>
    %20 = arith.addf %16, %19 : vector<1x8xf32>
    %c4_10 = arith.constant 4 : index
    %21 = memref.load %arg1[%c4_10] : memref<12xf32, #tpu.memory_space<smem>>
    %22 = vector.broadcast %21 : f32 to vector<1x8xf32>
    %23 = arith.mulf %4, %22 : vector<1x8xf32>
    %24 = arith.addf %20, %23 : vector<1x8xf32>
    %c5_11 = arith.constant 5 : index
    %25 = memref.load %arg1[%c5_11] : memref<12xf32, #tpu.memory_space<smem>>
    %26 = vector.broadcast %25 : f32 to vector<1x8xf32>
    %27 = arith.mulf %5, %26 : vector<1x8xf32>
    %28 = arith.addf %24, %27 : vector<1x8xf32>
    %c0_12 = arith.constant 0 : index
    %29 = memref.load %arg2[%c0_12] : memref<2xf32, #tpu.memory_space<smem>>
    %30 = vector.broadcast %29 : f32 to vector<1x8xf32>
    %31 = arith.addf %28, %30 : vector<1x8xf32>
    %c0_13 = arith.constant 0 : index
    %c0_14 = arith.constant 0 : index
    %32 = vector.load %arg4[%c0_13, %c0_14] : memref<2x8xf32, #tpu.memory_space<vmem>>, vector<1x8xf32>
    tpu.vector_store %arg4[%c0_13, %c0_14], %31 {strides = array<i32>} : memref<2x8xf32, #tpu.memory_space<vmem>>, vector<1x8xf32>,
    %c6 = arith.constant 6 : index
    %33 = memref.load %arg1[%c6] : memref<12xf32, #tpu.memory_space<smem>>
    %34 = vector.broadcast %33 : f32 to vector<1x8xf32>
    %35 = arith.mulf %0, %34 : vector<1x8xf32>
    %c7 = arith.constant 7 : index
    %36 = memref.load %arg1[%c7] : memref<12xf32, #tpu.memory_space<smem>>
    %37 = vector.broadcast %36 : f32 to vector<1x8xf32>
    %38 = arith.mulf %1, %37 : vector<1x8xf32>
    %39 = arith.addf %35, %38 : vector<1x8xf32>
    %c8 = arith.constant 8 : index
    %40 = memref.load %arg1[%c8] : memref<12xf32, #tpu.memory_space<smem>>
    %41 = vector.broadcast %40 : f32 to vector<1x8xf32>
    %42 = arith.mulf %2, %41 : vector<1x8xf32>
    %43 = arith.addf %39, %42 : vector<1x8xf32>
    %c9 = arith.constant 9 : index
    %44 = memref.load %arg1[%c9] : memref<12xf32, #tpu.memory_space<smem>>
    %45 = vector.broadcast %44 : f32 to vector<1x8xf32>
    %46 = arith.mulf %3, %45 : vector<1x8xf32>
    %47 = arith.addf %43, %46 : vector<1x8xf32>
    %c10 = arith.constant 10 : index
    %48 = memref.load %arg1[%c10] : memref<12xf32, #tpu.memory_space<smem>>
    %49 = vector.broadcast %48 : f32 to vector<1x8xf32>
    %50 = arith.mulf %4, %49 : vector<1x8xf32>
    %51 = arith.addf %47, %50 : vector<1x8xf32>
    %c11 = arith.constant 11 : index
    %52 = memref.load %arg1[%c11] : memref<12xf32, #tpu.memory_space<smem>>
    %53 = vector.broadcast %52 : f32 to vector<1x8xf32>
    %54 = arith.mulf %5, %53 : vector<1x8xf32>
    %55 = arith.addf %51, %54 : vector<1x8xf32>
    %c1_15 = arith.constant 1 : index
    %56 = memref.load %arg2[%c1_15] : memref<2xf32, #tpu.memory_space<smem>>
    %57 = vector.broadcast %56 : f32 to vector<1x8xf32>
    %58 = arith.addf %55, %57 : vector<1x8xf32>
    %c1_16 = arith.constant 1 : index
    %c0_17 = arith.constant 0 : index
    %59 = vector.load %arg4[%c1_16, %c0_17] : memref<2x8xf32, #tpu.memory_space<vmem>>, vector<1x8xf32>
    tpu.vector_store %arg4[%c1_16, %c0_17], %58 {strides = array<i32>} : memref<2x8xf32, #tpu.memory_space<vmem>>, vector<1x8xf32>,
    return
  }
  func.func @transform_0(%arg0: i32) -> i32 {
    %c0_i32 = arith.constant 0 : i32
    %c0_i32_0 = arith.constant 0 : i32
    return %c0_i32 : i32
  }
  func.func @transform_1(%arg0: i32) -> i32 {
    %c0_i32 = arith.constant 0 : i32
    %c0_i32_0 = arith.constant 0 : i32
    return %c0_i32 : i32
  }
  func.func @transform_2(%arg0: i32) -> (i32, i32) {
    %c0_i32 = arith.constant 0 : i32
    %c0_i32_0 = arith.constant 0 : i32
    return %c0_i32, %arg0 : i32, i32
  }
  func.func @transform_3(%arg0: i32) -> (i32, i32) {
    %c0_i32 = arith.constant 0 : i32
    %c0_i32_0 = arith.constant 0 : i32
    return %c0_i32, %arg0 : i32, i32
  }
}

</mosaic_0001>

<bundles_post_ra>
// kernel: tpu_custom_call.1
= control target key start
LH: loop header
LB: loop body
LE: loop exit
PB: predicated region body
PF: predicated region fallthrough
CT: control target
= control target key end

     0   :  { %8 = vsyncpa [#allocation5], 0  ;;  %s251_s0 = inlined_call_operand.hbm [shape: f32[12], index: 0, kind: input, shape index: {}]   ;;  %s252_s1 = inlined_call_operand.vmem [shape: f32[2], index: 1, kind: input, shape index: {}]   ;;  %s253_s2 = inlined_call_operand.hbm [shape: f32[6,8], index: 2, kind: input, shape index: {}]   ;;  %s254_s3 = inlined_call_operand.hbm [shape: f32[2,8], index: 3, kind: output, shape index: {}]  }
   0x1   :  { %9 = vsyncpa [#allocation6], 0 }
   0x2   :  { %10 = vsyncpa [#allocation3], 0 }
   0x3   :  { %11 = vsyncpa [#allocation4], 0  ;;  %s26_s14 = sshll.u32 %s252_s1, 4  ;;  %s212_s15 = smov [#allocation2]   ;;  %s27_s14 = int_to_ptr.vmem [resolvable:$true] %s26_s14 }
   0x4   :  { %19 = dma.hbm_to_smem %s251_s0, 16, %s212_s15, [#allocation5]  }
   0x5   :  { %s152_s18 = scalar_lea.vmem %s27_s14, 16  ;;  %p157_p1 = scmp.lt.s32.totalorder %s27_s14, %s27_s14 }
   0x6   :  { %p153_p0 = scmp.ne.s32.totalorder %s27_s14, %s152_s18  ;;  %p158_p2 = scmp.lt.s32.totalorder %s152_s18, %s152_s18 }
   0x8   :  { %p159_p3 = por %p158_p2, %p157_p1 }
   0xa   :  { %p160_p4 = pnand %p159_p3, %p153_p0 }
   0xc   :  { %163 = shalt.err (!%p160_p4)
}
   0xd   :  { %s213_s19 = smov [#allocation7]   ;;  %s214_s20 = smov [#allocation8]  }
   0xe   :  { %29 = dma.vmem_to_smem %s27_s14, 16, %s213_s19, [#allocation6]  }
   0xf   :  { %s36_s21 = sshll.u32 %s214_s20, 4  ;;  %s37_s21 = int_to_ptr.vmem [resolvable:$true] %s36_s21 }
  0x10   :  { %s172_s22 = scalar_lea.vmem %s37_s21, 128  ;;  %p177_p6 = scmp.lt.s32.totalorder %s37_s21, %s37_s21 }
  0x11   :  { %p173_p5 = scmp.ne.s32.totalorder %s37_s21, %s172_s22  ;;  %p178_p7 = scmp.lt.s32.totalorder %s172_s22, %s172_s22 }
  0x13   :  { %p179_p8 = por %p178_p7, %p177_p6 }
  0x15   :  { %p180_p9 = pnand %p179_p8, %p173_p5 }
  0x17   :  { %183 = shalt.err (!%p180_p9)
}
  0x18   :  { %39 = dma.hbm_to_vmem [thread:$0]  %s253_s2, 128, %s37_s21, [#allocation3]  }
  0x19   :  { %204 = dma.done.wait [#allocation5], 16  }
  0x1a   :  { %205 = vsyncadd [#allocation5], 4294967280 }
  0x1b   :  { %206 = dma.done.wait [#allocation6], 16  }
  0x1c   :  { %207 = vsyncadd [#allocation6], 4294967280 }
  0x1d   :  { %208 = dma.done.wait [#allocation3], 128  }
  0x1e   :  { %209 = vsyncadd [#allocation3], 4294967168 }
  0x1f   :  { %49 = sfence }
  0x20   :  { %s56_s23 = sld [smem:[#allocation2]]  ;;  %v50_v0 = vld [vmem:[#allocation8] sm:$0x1]  ;;  %v51_v1 = vld [vmem:[#allocation8 + $0x1] sm:$0x1]  ;;  %vm82_vm0 = vcmask 57344  }
  0x21   :  { %s128_s24 = sld [smem:[#allocation2 + $0x1]]  ;;  %v52_v2 = vld [vmem:[#allocation8 + $0x2] sm:$0x1]  ;;  %v53_v4 = vld [vmem:[#allocation8 + $0x3] sm:$0x1]  ;;  %s215_s9 = smov [#allocation9]  }
  0x22   :  { %s129_s25 = sld [smem:[#allocation2 + $0x2]]  ;;  %v54_v9 = vld [vmem:[#allocation8 + $0x4] sm:$0x1]  ;;  %v55_v15 = vld [vmem:[#allocation8 + $0x5] sm:$0x1]  ;;  %s117_s10 = sshll.u32 %s215_s9, 4  ;;  %s118_s10 = int_to_ptr.vmem [resolvable:$true] %s117_s10 }
  0x23   :  { %s130_s26 = sld [smem:[#allocation2 + $0x3]]  ;;  %s184_s11 = scalar_lea.vmem %s118_s10, 32 }
  0x24   :  { %s131_s27 = sld [smem:[#allocation2 + $0x4]]  ;;  %p185_p10 = scmp.ne.s32.totalorder %s118_s10, %s184_s11 }
  0x25   :  { %s132_s28 = sld [smem:[#allocation2 + $0x5]]  ;;  %p189_p11 = scmp.lt.s32.totalorder %s118_s10, %s118_s10 }
  0x26   :  { %v57_v3 = vstv %s56_s23  ;;  %s245_s29 = sld [smem:[#allocation7]]  ;;  %p190_p12 = scmp.lt.s32.totalorder %s184_s11, %s184_s11 }
  0x27   :  { %v58_v5 = vmul.f32 %v57_v3, %v50_v0  ;;  %v60_v6 = vstv %s128_s24  ;;  %s133_s2 = sld [smem:[#allocation2 + $0x6]] }
  0x28   :  { %v61_v7 = vmul.f32 %v60_v6, %v51_v1  ;;  %v64_v8 = vstv %s129_s25  ;;  %s134_s30 = sld [smem:[#allocation2 + $0x7]]  ;;  %p191_p13 = por %p190_p12, %p189_p11 }
  0x29   :  { %v65_v10 = vmul.f32 %v64_v8, %v52_v2  ;;  %v68_v11 = vstv %s130_s26  ;;  %s135_s4 = sld [smem:[#allocation2 + $0x8]] }
  0x2a   :  { %v62_v12 = vadd.f32 %v61_v7, %v58_v5  ;;  %v69_v13 = vmul.f32 %v68_v11, %v53_v4  ;;  %v72_v14 = vstv %s131_s27  ;;  %s136_s5 = sld [smem:[#allocation2 + $0x9]]  ;;  %p192_p0 = pnand %p191_p13, %p185_p10 }
  0x2b   :  { %v76_v16 = vstv %s132_s28  ;;  %s137_s6 = sld [smem:[#allocation2 + $0xa]]  ;;  %v73_v18 = vmul.f32 %v72_v14, %v54_v9 }
  0x2c   :  { %v66_v17 = vadd.f32 %v65_v10, %v62_v12  ;;  %s138_s7 = sld [smem:[#allocation2 + $0xb]]  ;;  %v77_v21 = vmul.f32 %v76_v16, %v55_v15  ;;  %v80_v29 = vstv %s245_s29 }
  0x2d   :  { %v85_v19 = vstv %s133_s2  ;;  %s139_s8 = sld [smem:[#allocation7 + $0x1]] }
  0x2e   :  { %v70_v20 = vadd.f32 %v69_v13, %v66_v17  ;;  %v86_v22 = vmul.f32 %v85_v19, %v50_v0  ;;  %v88_v23 = vstv %s134_s30 }
  0x2f   :  { %v89_v24 = vmul.f32 %v88_v23, %v51_v1  ;;  %v92_v25 = vstv %s135_s4 }
  0x30   :  { %v74_v26 = vadd.f32 %v73_v18, %v70_v20  ;;  %v93_v27 = vmul.f32 %v92_v25, %v52_v2  ;;  %v96_v28 = vstv %s136_s5 }
  0x31   :  { %v90_v30 = vadd.f32 %v89_v24, %v86_v22  ;;  %v97_v31 = vmul.f32 %v96_v28, %v53_v4  ;;  %v100_v32 = vstv %s137_s6 }
  0x32   :  { %v78_v33 = vadd.f32 %v77_v21, %v74_v26  ;;  %v104_v34 = vstv %s138_s7  ;;  %v101_v36 = vmul.f32 %v100_v32, %v54_v9 }
  0x33   :  { %v94_v35 = vadd.f32 %v93_v27, %v90_v30  ;;  %v105_v39 = vmul.f32 %v104_v34, %v55_v15  ;;  %v108_v41 = vstv %s139_s8 }
  0x34   :  { %v81_v37 = vadd.f32 %v80_v29, %v78_v33 }
  0x35   :  { %v98_v38 = vadd.f32 %v97_v31, %v94_v35 }
  0x36   :  { %83 = vst.msk [vmem:[#allocation9] sm:$0x1] %vm82_vm0, %v81_v37 }
  0x37   :  { %v102_v40 = vadd.f32 %v101_v36, %v98_v38 }
  0x39   :  { %v106_v42 = vadd.f32 %v105_v39, %v102_v40 }
  0x3b   :  { %v109_v43 = vadd.f32 %v108_v41, %v106_v42 }
  0x3d   :  { %110 = vst.msk [vmem:[#allocation9 + $0x1] sm:$0x1] %vm82_vm0, %v109_v43 }
  0x3e   :  { %195 = shalt.err (!%p192_p0)
}
  0x3f   :  { %120 = dma.vmem_to_hbm [thread:$0]  %s118_s10, 32, %s254_s3, [#allocation4]  }
  0x40   :  { %210 = dma.done.wait [#allocation4], 32  }
  0x41   :  { %211 = vsyncadd [#allocation4], 4294967264 }
  0x42   :  { %124 = vsyncpa [#allocation3], 1 }
  0x43   :  { %125 = vsyncpa [#allocation4], 1 }
  0x44   :  { %126 = vsyncpa [#allocation5], 1 }
  0x45   :  { %127 = vsyncpa [#allocation6], 1 }

</bundles_post_ra>
